<compile_context>
chip_gen: v7x
topology: tpu7x:2x2x1
jax: 0.10.0
libtpu: 0.0.40
codegen_flags: <defaults>
</compile_context>

<pallas_src>
import functools

import jax
import jax.numpy as jnp
from jax.experimental import pallas as pl
from jax.experimental.pallas import tpu as pltpu


def _round_up(x, m):
    return ((x + m - 1) // m) * m


def _make_mean_kernel(n_layers):
    """MLP forward for one batch tile: n_layers hidden tanh layers + linear out."""
    n_linear = n_layers + 1

    def kernel(*refs):
        # refs: obs_tile, (w, b) * n_linear, mean_tile_out
        obs_ref = refs[0]
        wb_refs = refs[1:1 + 2 * n_linear]
        mean_ref = refs[1 + 2 * n_linear]

        x = obs_ref[...]                         # already f32; no redundant cast
        for layer in range(n_linear):
            w = wb_refs[2 * layer][...]
            b = wb_refs[2 * layer + 1][...]
            x = jnp.dot(x, w, preferred_element_type=jnp.float32) + b
            if layer < n_layers:                 # hidden layers tanh, output identity
                x = jnp.tanh(x)
        mean_ref[...] = x.astype(mean_ref.dtype)

    return kernel


def _cost_estimate(batch, ob_dim, ac_dim, params_flat):
    flops = 0
    transcendentals = 0
    n_linear = len(params_flat) // 2
    for li in range(n_linear):
        k, n = params_flat[2 * li].shape
        flops += 2 * batch * k * n
        if li < n_linear - 1:
            transcendentals += batch * n
    bytes_accessed = 4 * (batch * ob_dim
                          + sum(int(p.size) for p in params_flat)
                          + batch * ac_dim)
    return pl.CostEstimate(flops=flops, transcendentals=transcendentals,
                           bytes_accessed=bytes_accessed)


def init_mlp_policy_params(key, ob_dim, ac_dim, n_layers, size):
    """Deterministic synthetic parameters matching ptu.build_mlp shapes."""
    dims = [ob_dim] + [size] * n_layers + [ac_dim]
    params = []
    for i in range(len(dims) - 1):
        key, kw = jax.random.split(key)
        fan_in = dims[i]
        w = jax.random.uniform(kw, (dims[i], dims[i + 1]), jnp.float32,
                               -1.0 / jnp.sqrt(fan_in), 1.0 / jnp.sqrt(fan_in))
        b = jnp.zeros((1, dims[i + 1]), jnp.float32)
        params.append((w, b))
    logstd = jnp.zeros((1, ac_dim), jnp.float32)   # nn.Parameter(torch.zeros(ac_dim))
    return params, logstd


@functools.partial(jax.jit, static_argnames=("n_layers", "block_batch"))
def mlp_policy_forward(obs, params_flat, logstd, *, n_layers, block_batch=512):
    """Returns (batch_mean, batch_scale_tril) of the MultivariateNormal."""
    batch, ob_dim = obs.shape
    ac_dim = logstd.shape[-1]

    # Batch tile: multiple of 8 (sublane), capped at block_batch, padded batch.
    tb = min(block_batch, _round_up(batch, 8))
    padded = _round_up(batch, tb)
    obs_p = obs if padded == batch else jnp.pad(obs, ((0, padded - batch), (0, 0)))
    grid = (padded // tb,)

    # obs / mean tiled over the batch grid; weights & biases VMEM-resident
    # (constant index_map) across all grid steps.
    in_specs = [pl.BlockSpec((tb, ob_dim), lambda i: (i, 0))]
    for p in params_flat:
        in_specs.append(pl.BlockSpec(p.shape, lambda i: (0, 0)))
    out_specs = pl.BlockSpec((tb, ac_dim), lambda i: (i, 0))

    kernel = _make_mean_kernel(n_layers)
    mean_p = pl.pallas_call(
        kernel,
        out_shape=jax.ShapeDtypeStruct((padded, ac_dim), jnp.float32),
        grid=grid,
        in_specs=in_specs,
        out_specs=out_specs,
        compiler_params=pltpu.CompilerParams(
            dimension_semantics=("parallel",)),
        cost_estimate=_cost_estimate(padded, ob_dim, ac_dim, params_flat),
    )(obs_p, *params_flat)
    mean = mean_p[:batch] if padded != batch else mean_p

    # scale_tril = diag(exp(logstd)), broadcast over the batch.  Done in plain
    # JAX: it is replicated data, XLA broadcasts it lazily (no masked stores,
    # no wasted HBM writeback from the kernel).
    scale_tril = jnp.broadcast_to(jnp.diag(jnp.exp(logstd[0]))[None, :, :],
                                  (batch, ac_dim, ac_dim))
    return mean, scale_tril


def _reference_forward(obs, params, logstd):
    x = obs
    n_linear = len(params)
    for i, (w, b) in enumerate(params):
        x = x @ w + b
        if i < n_linear - 1:
            x = jnp.tanh(x)
    mean = x
    tril = jnp.broadcast_to(jnp.diag(jnp.exp(logstd[0]))[None],
                            (obs.shape[0],) + (logstd.shape[-1],) * 2)
    return mean, tril


if __name__ == "__main__":
    # Small shapes consistent with the module: obs [batch, ob_dim].
    ob_dim, ac_dim, n_layers, size = 16, 4, 2, 32

    key = jax.random.PRNGKey(0)
    key, kparams = jax.random.split(key)
    params, logstd = init_mlp_policy_params(kparams, ob_dim, ac_dim, n_layers, size)
    params_flat = tuple(t for wb in params for t in wb)

    # Test both an aligned batch and a ragged batch (exercises padding path).
    for batch in (8, 13):
        key, kobs = jax.random.split(key)
        obs = jax.random.normal(kobs, (batch, ob_dim), jnp.float32)

        mean, scale_tril = mlp_policy_forward(obs, params_flat, logstd,
                                              n_layers=n_layers)
        jax.block_until_ready((mean, scale_tril))

        ref_mean, ref_tril = _reference_forward(obs, params, logstd)
        assert mean.shape == (batch, ac_dim)
        assert scale_tril.shape == (batch, ac_dim, ac_dim)
        assert jnp.allclose(mean, ref_mean, atol=1e-5, rtol=1e-5)
        assert jnp.allclose(scale_tril, ref_tril, atol=1e-6, rtol=1e-6)

    print("KERNEL_OK")
</pallas_src>

<mosaic_0001>
module attributes {stable_mosaic.version = 11 : i64} {
  func.func @kernel(%arg0: i32, %arg1: memref<8x16xf32, #tpu.memory_space<vmem>>, %arg2: memref<16x32xf32, #tpu.memory_space<vmem>>, %arg3: memref<1x32xf32, #tpu.memory_space<vmem>>, %arg4: memref<32x32xf32, #tpu.memory_space<vmem>>, %arg5: memref<1x32xf32, #tpu.memory_space<vmem>>, %arg6: memref<32x4xf32, #tpu.memory_space<vmem>>, %arg7: memref<1x4xf32, #tpu.memory_space<vmem>>, %arg8: memref<8x4xf32, #tpu.memory_space<vmem>>) attributes {dimension_semantics = [#tpu.dimension_semantics<parallel>], iteration_bounds = array<i64: 1>, scalar_prefetch = 0 : i64, scratch_operands = 0 : i64, tpu.core_type = #tpu.core_type<tc>, window_params = [{transform_indices = @transform_0, window_bounds = array<i64: 8, 16>}, {pipeline_mode = #tpu.pipeline_mode<synchronous>, transform_indices = @transform_1, window_bounds = array<i64: 16, 32>}, {pipeline_mode = #tpu.pipeline_mode<synchronous>, transform_indices = @transform_2, window_bounds = array<i64: 1, 32>}, {pipeline_mode = #tpu.pipeline_mode<synchronous>, transform_indices = @transform_3, window_bounds = array<i64: 32, 32>}, {pipeline_mode = #tpu.pipeline_mode<synchronous>, transform_indices = @transform_4, window_bounds = array<i64: 1, 32>}, {pipeline_mode = #tpu.pipeline_mode<synchronous>, transform_indices = @transform_5, window_bounds = array<i64: 32, 4>}, {pipeline_mode = #tpu.pipeline_mode<synchronous>, transform_indices = @transform_6, window_bounds = array<i64: 1, 4>}, {transform_indices = @transform_7, window_bounds = array<i64: 8, 4>}]} {
    %c0 = arith.constant 0 : index
    %c0_0 = arith.constant 0 : index
    %0 = vector.load %arg1[%c0, %c0_0] : memref<8x16xf32, #tpu.memory_space<vmem>>, vector<8x16xf32>
    %c0_1 = arith.constant 0 : index
    %c0_2 = arith.constant 0 : index
    %1 = vector.load %arg2[%c0_1, %c0_2] : memref<16x32xf32, #tpu.memory_space<vmem>>, vector<16x32xf32>
    %c0_3 = arith.constant 0 : index
    %c0_4 = arith.constant 0 : index
    %2 = vector.load %arg3[%c0_3, %c0_4] : memref<1x32xf32, #tpu.memory_space<vmem>>, vector<1x32xf32>
    %cst = arith.constant dense<0.000000e+00> : vector<8x32xf32>
    %3 = tpu.matmul %0, %1, %cst {dimension_numbers = #tpu.dot_dimension_numbers<[1], [0], [0], [1], [0, 0, 1, 1], [], []>} : vector<8x16xf32>, vector<16x32xf32>, vector<8x32xf32> -> vector<8x32xf32>
    %4 = vector.broadcast %2 : vector<1x32xf32> to vector<8x32xf32>
    %5 = arith.addf %3, %4 : vector<8x32xf32>
    %6 = math.tanh %5 : vector<8x32xf32>
    %c0_5 = arith.constant 0 : index
    %c0_6 = arith.constant 0 : index
    %7 = vector.load %arg4[%c0_5, %c0_6] : memref<32x32xf32, #tpu.memory_space<vmem>>, vector<32x32xf32>
    %c0_7 = arith.constant 0 : index
    %c0_8 = arith.constant 0 : index
    %8 = vector.load %arg5[%c0_7, %c0_8] : memref<1x32xf32, #tpu.memory_space<vmem>>, vector<1x32xf32>
    %cst_9 = arith.constant dense<0.000000e+00> : vector<8x32xf32>
    %9 = tpu.matmul %6, %7, %cst_9 {dimension_numbers = #tpu.dot_dimension_numbers<[1], [0], [0], [1], [0, 0, 1, 1], [], []>} : vector<8x32xf32>, vector<32x32xf32>, vector<8x32xf32> -> vector<8x32xf32>
    %10 = vector.broadcast %8 : vector<1x32xf32> to vector<8x32xf32>
    %11 = arith.addf %9, %10 : vector<8x32xf32>
    %12 = math.tanh %11 : vector<8x32xf32>
    %c0_10 = arith.constant 0 : index
    %c0_11 = arith.constant 0 : index
    %13 = vector.load %arg6[%c0_10, %c0_11] : memref<32x4xf32, #tpu.memory_space<vmem>>, vector<32x4xf32>
    %c0_12 = arith.constant 0 : index
    %c0_13 = arith.constant 0 : index
    %14 = vector.load %arg7[%c0_12, %c0_13] : memref<1x4xf32, #tpu.memory_space<vmem>>, vector<1x4xf32>
    %cst_14 = arith.constant dense<0.000000e+00> : vector<8x4xf32>
    %15 = tpu.matmul %12, %13, %cst_14 {dimension_numbers = #tpu.dot_dimension_numbers<[1], [0], [0], [1], [0, 0, 1, 1], [], []>} : vector<8x32xf32>, vector<32x4xf32>, vector<8x4xf32> -> vector<8x4xf32>
    %16 = vector.broadcast %14 : vector<1x4xf32> to vector<8x4xf32>
    %17 = arith.addf %15, %16 : vector<8x4xf32>
    %c0_15 = arith.constant 0 : index
    %c0_16 = arith.constant 0 : index
    %18 = vector.load %arg8[%c0_15, %c0_16] : memref<8x4xf32, #tpu.memory_space<vmem>>, vector<8x4xf32>
    tpu.vector_store %arg8[%c0_15, %c0_16], %17 {strides = array<i32>} : memref<8x4xf32, #tpu.memory_space<vmem>>, vector<8x4xf32>,
    return
  }
  func.func @transform_0(%arg0: i32) -> (i32, i32) {
    %c0_i32 = arith.constant 0 : i32
    %c0_i32_0 = arith.constant 0 : i32
    return %arg0, %c0_i32 : i32, i32
  }
  func.func @transform_1(%arg0: i32) -> (i32, i32) {
    %c0_i32 = arith.constant 0 : i32
    %c0_i32_0 = arith.constant 0 : i32
    %c0_i32_1 = arith.constant 0 : i32
    return %c0_i32, %c0_i32_0 : i32, i32
  }
  func.func @transform_2(%arg0: i32) -> (i32, i32) {
    %c0_i32 = arith.constant 0 : i32
    %c0_i32_0 = arith.constant 0 : i32
    %c0_i32_1 = arith.constant 0 : i32
    return %c0_i32, %c0_i32_0 : i32, i32
  }
  func.func @transform_3(%arg0: i32) -> (i32, i32) {
    %c0_i32 = arith.constant 0 : i32
    %c0_i32_0 = arith.constant 0 : i32
    %c0_i32_1 = arith.constant 0 : i32
    return %c0_i32, %c0_i32_0 : i32, i32
  }
  func.func @transform_4(%arg0: i32) -> (i32, i32) {
    %c0_i32 = arith.constant 0 : i32
    %c0_i32_0 = arith.constant 0 : i32
    %c0_i32_1 = arith.constant 0 : i32
    return %c0_i32, %c0_i32_0 : i32, i32
  }
  func.func @transform_5(%arg0: i32) -> (i32, i32) {
    %c0_i32 = arith.constant 0 : i32
    %c0_i32_0 = arith.constant 0 : i32
    %c0_i32_1 = arith.constant 0 : i32
    return %c0_i32, %c0_i32_0 : i32, i32
  }
  func.func @transform_6(%arg0: i32) -> (i32, i32) {
    %c0_i32 = arith.constant 0 : i32
    %c0_i32_0 = arith.constant 0 : i32
    %c0_i32_1 = arith.constant 0 : i32
    return %c0_i32, %c0_i32_0 : i32, i32
  }
  func.func @transform_7(%arg0: i32) -> (i32, i32) {
    %c0_i32 = arith.constant 0 : i32
    %c0_i32_0 = arith.constant 0 : i32
    return %arg0, %c0_i32 : i32, i32
  }
}

</mosaic_0001>

<bundles_post_ra>
// kernel: mlp_policy_forward.1
= control target key start
LH: loop header
LB: loop body
LE: loop exit
PB: predicated region body
PF: predicated region fallthrough
CT: control target
= control target key end

     0   :  { %12 = vsyncpa [#allocation3], 0  ;;  %s395_s24 = smov [#allocation2]   ;;  %s495_s0 = inlined_call_operand.vmem [shape: f32[8,16], index: 0, kind: input, shape index: {}]   ;;  %s496_s1 = inlined_call_operand.vmem [shape: f32[16,32], index: 1, kind: input, shape index: {}]   ;;  %s497_s2 = inlined_call_operand.vmem [shape: f32[1,32], index: 2, kind: input, shape index: {}]   ;;  %s498_s3 = inlined_call_operand.vmem [shape: f32[32,32], index: 3, kind: input, shape index: {}]   ;;  %s499_s4 = inlined_call_operand.vmem [shape: f32[1,32], index: 4, kind: input, shape index: {}]   ;;  %s500_s5 = inlined_call_operand.vmem [shape: f32[32,4], index: 5, kind: input, shape index: {}]   ;;  %s501_s6 = inlined_call_operand.hbm [shape: f32[1,4], index: 6, kind: input, shape index: {}]   ;;  %s502_s7 = inlined_call_operand.vmem [shape: f32[8,4], index: 7, kind: output, shape index: {}]  }
   0x1   :  { %s31_s25 = sshll.u32 %s395_s24, 4  ;;  %s371_s28 = scalar_lea.hbm %s501_s6, 16  ;;  %s32_s25 = int_to_ptr.vmem [resolvable:$true] %s31_s25 }
   0x2   :  { %p372_p0 = scmp.ne.s32.totalorder %s501_s6, %s371_s28  ;;  %p375_p1 = scmp.lt.u32.totalorder %s371_s28, %s501_s6 }
   0x4   :  { %p377_p2 = pnand %p375_p1, %p372_p0 }
   0x6   :  { %380 = shalt.err (!%p377_p2)
}
   0x7   :  { %s381_s10 = scalar_lea.vmem %s32_s25, 16  ;;  %s385_s11 = scalar_lea.vmem %s32_s25, 32 }
   0x8   :  { %p382_p3 = scmp.ne.s32.totalorder %s32_s25, %s381_s10  ;;  %p386_p4 = scmp.lt.s32.totalorder %s32_s25, %s32_s25 }
   0x9   :  { %p387_p5 = scmp.lt.s32.totalorder %s385_s11, %s381_s10 }
   0xb   :  { %p388_p6 = por %p387_p5, %p386_p4 }
   0xd   :  { %p389_p7 = pnand %p388_p6, %p382_p3 }
   0xf   :  { %392 = shalt.err (!%p389_p7)
}
  0x10   :  { %34 = dma.hbm_to_vmem [thread:$0]  %s501_s6, 16, %s32_s25, [#allocation3]  }
  0x11   :  { %393 = dma.done.wait [#allocation3], 16  }
  0x12   :  { %394 = vsyncadd [#allocation3], 4294967280  ;;  %v396_v0 = vmov 0.0|0.0   ;;  %vm397_vm0 = vmmov 0   ;;  %v398_v1 = vmov 0.0   ;;  %v39_v2 = vld [vmem:[%s496_s1] sm:$0xff] }
  0x13   :  { %348 = vmatprep.subr.bf16.mxu0 %v396_v0  ;;  %323 = vmatprep.mubr.msk.f32.mxu0 %vm397_vm0, %v398_v1  ;;  %v40_v3 = vld [vmem:[%s496_s1 + $0x8] sm:$0xff]  ;;  %v38_v5 = vld [vmem:[%s495_s0] sm:$0xff]  ;;  %vm48_vm1 = vcmask 130048   ;;  %v125_v8 = vld [vmem:[%s498_s3 + $0x10] sm:$0xff]  ;;  %vm134_vm2 = vcmask 261120   ;;  %vm293_vm3 = vcmask 31744  }
  0x14   :  { %351 = vmatprep.subr.bf16.mxu1 %v396_v0  ;;  %334 = vmatprep.mubr.msk.f32.mxu1 %vm397_vm0, %v398_v1  ;;  %v349_v4 = vpack.c.bf16 %v40_v3, %v39_v2  ;;  %v123_v6 = vld [vmem:[%s498_s3] sm:$0xff]  ;;  %v124_v7 = vld [vmem:[%s498_s3 + $0x8] sm:$0xff]  ;;  %v126_v10 = vld [vmem:[%s498_s3 + $0x18] sm:$0xff] }
  0x15   :  { %v352_v9 = vpack.c.bf16 %v124_v7, %v123_v6  ;;  %v355_v11 = vpack.c.bf16 %v126_v10, %v125_v8  ;;  %v300_v12 = vld [vmem:[%s497_s2] ss:$0 sm:$0xff]  ;;  %v210_v18 = vld [vmem:[%s500_s5 + $0x8] sm:$0xff]  ;;  %v211_v19 = vld [vmem:[%s500_s5 + $0x10] sm:$0xff] }
  0x16   :  { %350 = vmatpush3.bf16.msra.mxu0 %v349_v4  ;;  %v209_v17 = vld [vmem:[%s500_s5] sm:$0xff]  ;;  %v212_v21 = vld [vmem:[%s500_s5 + $0x18] sm:$0xff] }
  0x17   :  { %357 = vmatprep.subr.bf16.mxu0 %v396_v0  ;;  %353 = vmatpush3.bf16.msra.mxu1 %v352_v9  ;;  %v358_v20 = vpack.c.bf16 %v210_v18, %v209_v17  ;;  %v361_v22 = vpack.c.bf16 %v212_v21, %v211_v19  ;;  %v302_v23 = vld [vmem:[%s499_s4] ss:$0 sm:$0xff] }
  0x18   :  { %354 = vmatprep.subr.bf16.mxu1 %v396_v0  ;;  %v304_v28 = vld [vmem:[#allocation2] ss:$0 sm:$0xff] }
  0x19   :  { %324 = vmatmul.mubr.msk.f32.vlgmr.msra.gmra.mrb[0].mxu0 %vm48_vm1, %v38_v5 }
  0x1a   :  { %345 = vmatprep.mubr.msk.f32.mxu0 %vm397_vm0, %v398_v1  ;;  %359 = vmatpush3.bf16.msra.mxu0 %v358_v20 }
  0x1b   :  { %356 = vmatpush3.bf16.msra.mxu1 %v355_v11  ;;  %360 = vmatprep.subr.bf16.mxu0 %v396_v0 }
  0x1e   :  { %362 = vmatpush3.bf16.msra.mxu0 %v361_v22 }
  0xec   :  { %v118_v13 = vpop.f32.mrb[0].mxu0 }
  0xed   :  { %v119_v14 = vadd.f32 %v300_v12, %v118_v13  ;;  %v325_v15 = vpop.f32.mrb[1].mxu0 }
  0xef   :  { %367 = vtanh.f32 %v119_v14 }
  0xf9   :  { %v368_v16 = vpop.eup %367 }
  0xfa   :  { %335 = vmatmul.mubr.msk.f32.vlgmr.msra.gmra.mrb[0].mxu1 %vm134_vm2, %v368_v16 }
 0x1cd   :  { %v204_v24 = vpop.f32.mrb[0].mxu1 }
 0x1ce   :  { %v205_v25 = vadd.f32 %v302_v23, %v204_v24  ;;  %v336_v26 = vpop.f32.mrb[1].mxu1 }
 0x1d0   :  { %369 = vtanh.f32 %v205_v25 }
 0x1da   :  { %v370_v27 = vpop.eup %369 }
 0x1db   :  { %346 = vmatmul.mubr.msk.f32.vlgmr.msra.gmra.mrb[2].mxu0 %vm134_vm2, %v370_v27 }
 0x2ae   :  { %v289_v29 = vpop.f32.mrb[2].mxu0 }
 0x2af   :  { %v290_v30 = vadd.f32 %v304_v28, %v289_v29  ;;  %v347_v31 = vpop.f32.mrb[3].mxu0 }
 0x2b1   :  { %294 = vst.msk [vmem:[%s502_s7] sm:$0xff] %vm293_vm3, %v290_v30 }
 0x2b2   :  { %299 = vsyncpa [#allocation3], 1 }

</bundles_post_ra>
